<compile_context>
chip_gen: v7x
topology: tpu7x:2x2x1
jax: 0.10.0
libtpu: 0.0.40
codegen_flags: <defaults>
</compile_context>

<pallas_src>
import functools

import jax
import jax.numpy as jnp
from jax.experimental import pallas as pl
from jax.experimental.pallas import tpu as pltpu


def _round_up(v, m):
    return ((v + m - 1) // m) * m


def _fused_mlp_kernel(x_ref, *refs, n_layers, compute_dtype):
    """refs = (w1, b1, w2, b2, ..., wn, bn, o_ref).

    y_i = relu(x_{i-1} @ W_i + b_i) for all but the last layer (no relu there).
    Matmuls run on the MXU in `compute_dtype`, accumulation/bias/relu in f32.
    Intermediate activations stay in vregs/VMEM; only the final layer's output
    (at its true width) is written to o_ref.
    """
    o_ref = refs[-1]
    h = x_ref[...].astype(compute_dtype)
    for i in range(n_layers):
        w = refs[2 * i][...]            # (K_i, N_i) true shape, compute_dtype, VMEM-resident
        b = refs[2 * i + 1][...]        # (1, N_i), f32
        acc = jnp.dot(h, w, preferred_element_type=jnp.float32)
        acc = acc + b                   # broadcast over rows
        if i < n_layers - 1:
            acc = jnp.maximum(acc, 0.0)
            h = acc.astype(compute_dtype)
        else:
            o_ref[...] = acc.astype(o_ref.dtype)


def init_mlp_params(key, n_inputs, mlp_width, mlp_depth, n_outputs, dtype=jnp.float32):
    """Parameter init matching the module's layer shapes.

    Layers:
      input:   Linear(n_inputs, mlp_width)
      hiddens: (mlp_depth - 2) x Linear(mlp_width, mlp_width)
      output:  Linear(mlp_width, n_outputs)
    Weights stored as (in, out) (transpose of nn.Linear.weight); biases (1, out).
    """
    dims = [n_inputs] + [mlp_width] * (mlp_depth - 1) + [n_outputs]
    params = []
    for i in range(len(dims) - 1):
        fan_in, fan_out = dims[i], dims[i + 1]
        key, wk, bk = jax.random.split(key, 3)
        bound = 1.0 / jnp.sqrt(fan_in)
        w = jax.random.uniform(wk, (fan_in, fan_out), dtype, -bound, bound)
        b = jax.random.uniform(bk, (1, fan_out), dtype, -bound, bound)
        params.append((w, b))
    return params


def prepare_params(params, compute_dtype=jnp.bfloat16):
    """One-time prep: cast weights to the MXU compute dtype, keep biases f32.

    No shape padding: 32/64/16 are multiples of 8 (f32 sublane) and 16 (bf16
    sublane packing), and keeping the true contraction (K) dims avoids feeding
    zero rows through the MXU (v5e) and extra HBM bytes everywhere.
    """
    prepped = []
    for w, b in params:
        prepped.append((w.astype(compute_dtype), b.astype(jnp.float32)))
    return prepped


def mlp_forward(x, prepped_params, *, compute_dtype=jnp.bfloat16,
                block_m=1024, vmem_limit_bytes=32 * 1024 * 1024):
    """Fused MLP forward.  x: (M, n_inputs) -> (M, n_outputs)."""
    M, K = x.shape
    out_dtype = x.dtype
    n_layers = len(prepped_params)
    assert prepped_params[0][0].shape[0] == K, "x feature dim != first layer fan_in"
    n_outputs = prepped_params[-1][0].shape[1]

    # Row tile: multiple of 8 sublanes, capped at block_m, and chosen so that
    # whenever M permits there are >= 2 grid steps (v7x has 2 TensorCores and
    # "parallel" only helps with >= 2 tiles to shard).
    tm = max(8, min(block_m, _round_up(pl.cdiv(M, 2), 8)))
    M_pad = _round_up(M, tm)

    # Only pad batch rows (cheap, and only when tm does not divide M); the
    # feature dim is never padded and x is never cast in the wrapper — the
    # kernel casts to compute_dtype after the (single) HBM read.
    if M_pad != M:
        x_in = jnp.zeros((M_pad, K), x.dtype).at[:M, :].set(x)
    else:
        x_in = x

    # --- VMEM residency guard (v7x has 64 MiB physical VMEM) ----------------
    # Weights/biases are double-buffered by the pipeline even though their
    # index_map is grid-invariant; count them twice to be conservative.
    resident_bytes = 2 * sum(
        w.size * w.dtype.itemsize + b.size * b.dtype.itemsize
        for w, b in prepped_params)
    max_width = max(w.shape[1] for w, _ in prepped_params)
    tile_bytes = (2 * tm * K * x_in.dtype.itemsize            # double-buffered x tile
                  + 2 * tm * n_outputs * jnp.dtype(out_dtype).itemsize  # out tile
                  + 2 * tm * max_width * 4)                   # f32 intermediate activations
    if resident_bytes + tile_bytes > vmem_limit_bytes:
        raise ValueError(
            f"VMEM-resident footprint {(resident_bytes + tile_bytes) / 2**20:.1f} MiB "
            f"exceeds vmem_limit_bytes={vmem_limit_bytes / 2**20:.1f} MiB; reduce block_m "
            "or switch to a K-tiled grid with a VMEM accumulator for large mlp_width.")

    # x: batch-tiled; last dim equals the full array dim (legal block shape).
    in_specs = [pl.BlockSpec((tm, K), lambda i: (i, 0))]
    flat_params = []
    for w, b in prepped_params:
        # Grid-invariant index_maps -> weights/biases are fetched once and stay
        # resident in VMEM across all batch tiles.
        in_specs.append(pl.BlockSpec(w.shape, lambda i: (0, 0)))
        in_specs.append(pl.BlockSpec(b.shape, lambda i: (0, 0)))
        flat_params += [w, b]

    kernel = functools.partial(_fused_mlp_kernel, n_layers=n_layers,
                               compute_dtype=compute_dtype)

    out = pl.pallas_call(
        kernel,
        out_shape=jax.ShapeDtypeStruct((M_pad, n_outputs), out_dtype),
        grid=(M_pad // tm,),
        in_specs=in_specs,
        # Output written at its true width: 8x fewer HBM write bytes than a
        # 128-padded f32 slab, and no wrapper column-slice pass.
        out_specs=pl.BlockSpec((tm, n_outputs), lambda i: (i, 0)),
        compiler_params=pltpu.CompilerParams(
            dimension_semantics=("parallel",),   # batch tiles shard over v7x's 2 TCs
            vmem_limit_bytes=vmem_limit_bytes,
        ),
    )(x_in, *flat_params)

    return out if M_pad == M else out[:M]


def mlp_reference(x, params):
    """Pure-JAX f32 reference of MLP.forward (dropout == identity in eval)."""
    n_layers = len(params)
    for idx, (w, b) in enumerate(params):
        x = x @ w + b
        if idx != n_layers - 1:
            x = jnp.maximum(x, 0.0)
    return x


if __name__ == "__main__":
    # Config consistent with the module: n_inputs=32, MLP_WIDTH=64, MLP_DEPTH=3,
    # n_outputs=16  (-> input Linear, 1 hidden Linear, output Linear).
    n_inputs, mlp_width, mlp_depth, n_outputs = 32, 64, 3, 16

    key = jax.random.PRNGKey(0)
    key, xk1, xk2, xk3 = jax.random.split(key, 4)
    params = init_mlp_params(key, n_inputs, mlp_width, mlp_depth, n_outputs)

    prep_f32 = prepare_params(params, compute_dtype=jnp.float32)
    prep_bf16 = prepare_params(params, compute_dtype=jnp.bfloat16)

    # --- Check 1: small batch, f32 MXU inputs, strict tolerance -------------
    x_small = jax.random.normal(xk1, (8, n_inputs), jnp.float32)
    out1 = jax.block_until_ready(
        mlp_forward(x_small, prep_f32, compute_dtype=jnp.float32))
    ref1 = mlp_reference(x_small, params)
    assert out1.shape == (8, n_outputs)
    assert jnp.allclose(out1, ref1, atol=1e-5, rtol=1e-5), "f32 small-batch mismatch"

    # --- Check 2: batch not divisible by the tile -> row-padding path,
    #              2 grid steps (both v7x TCs active) ------------------------
    x_mid = jax.random.normal(xk2, (200, n_inputs), jnp.float32)
    out2 = jax.block_until_ready(
        mlp_forward(x_mid, prep_f32, compute_dtype=jnp.float32))
    ref2 = mlp_reference(x_mid, params)
    assert out2.shape == (200, n_outputs)
    assert jnp.allclose(out2, ref2, atol=1e-5, rtol=1e-5), "f32 padded-rows mismatch"

    # --- Check 3: larger batch, no padding, exactly 2 grid steps ------------
    x_big = jax.random.normal(xk3, (512, n_inputs), jnp.float32)
    out3 = jax.block_until_ready(
        mlp_forward(x_big, prep_f32, compute_dtype=jnp.float32))
    ref3 = mlp_reference(x_big, params)
    assert out3.shape == (512, n_outputs)
    assert jnp.allclose(out3, ref3, atol=1e-5, rtol=1e-5), "f32 tiled mismatch"

    # --- Check 4: bf16 MXU inputs (v5e/v6e perf mode), f32 accumulation -----
    out4 = jax.block_until_ready(
        mlp_forward(x_big, prep_bf16, compute_dtype=jnp.bfloat16))
    assert out4.shape == (512, n_outputs)
    assert jnp.allclose(out4, ref3, atol=5e-2, rtol=5e-2), "bf16 mismatch vs f32 ref"

    print("KERNEL_OK")
</pallas_src>

<mosaic_0001>
module attributes {stable_mosaic.version = 11 : i64} {
  func.func @_fused_mlp_kernel(%arg0: i32, %arg1: memref<8x32xf32, #tpu.memory_space<vmem>>, %arg2: memref<32x64xf32, #tpu.memory_space<vmem>>, %arg3: memref<1x64xf32, #tpu.memory_space<vmem>>, %arg4: memref<64x64xf32, #tpu.memory_space<vmem>>, %arg5: memref<1x64xf32, #tpu.memory_space<vmem>>, %arg6: memref<64x16xf32, #tpu.memory_space<vmem>>, %arg7: memref<1x16xf32, #tpu.memory_space<vmem>>, %arg8: memref<8x16xf32, #tpu.memory_space<vmem>>) attributes {dimension_semantics = [#tpu.dimension_semantics<parallel>], iteration_bounds = array<i64: 1>, scalar_prefetch = 0 : i64, scratch_operands = 0 : i64, tpu.core_type = #tpu.core_type<tc>, window_params = [{transform_indices = @transform_0, window_bounds = array<i64: 8, 32>}, {pipeline_mode = #tpu.pipeline_mode<synchronous>, transform_indices = @transform_1, window_bounds = array<i64: 32, 64>}, {pipeline_mode = #tpu.pipeline_mode<synchronous>, transform_indices = @transform_2, window_bounds = array<i64: 1, 64>}, {pipeline_mode = #tpu.pipeline_mode<synchronous>, transform_indices = @transform_3, window_bounds = array<i64: 64, 64>}, {pipeline_mode = #tpu.pipeline_mode<synchronous>, transform_indices = @transform_4, window_bounds = array<i64: 1, 64>}, {pipeline_mode = #tpu.pipeline_mode<synchronous>, transform_indices = @transform_5, window_bounds = array<i64: 64, 16>}, {pipeline_mode = #tpu.pipeline_mode<synchronous>, transform_indices = @transform_6, window_bounds = array<i64: 1, 16>}, {transform_indices = @transform_7, window_bounds = array<i64: 8, 16>}]} {
    %c0 = arith.constant 0 : index
    %c0_0 = arith.constant 0 : index
    %0 = vector.load %arg1[%c0, %c0_0] : memref<8x32xf32, #tpu.memory_space<vmem>>, vector<8x32xf32>
    %c0_1 = arith.constant 0 : index
    %c0_2 = arith.constant 0 : index
    %1 = vector.load %arg2[%c0_1, %c0_2] : memref<32x64xf32, #tpu.memory_space<vmem>>, vector<32x64xf32>
    %c0_3 = arith.constant 0 : index
    %c0_4 = arith.constant 0 : index
    %2 = vector.load %arg3[%c0_3, %c0_4] : memref<1x64xf32, #tpu.memory_space<vmem>>, vector<1x64xf32>
    %cst = arith.constant dense<0.000000e+00> : vector<8x64xf32>
    %3 = tpu.matmul %0, %1, %cst {dimension_numbers = #tpu.dot_dimension_numbers<[1], [0], [0], [1], [0, 0, 1, 1], [], []>} : vector<8x32xf32>, vector<32x64xf32>, vector<8x64xf32> -> vector<8x64xf32>
    %4 = vector.broadcast %2 : vector<1x64xf32> to vector<8x64xf32>
    %5 = arith.addf %3, %4 : vector<8x64xf32>
    %cst_5 = arith.constant 0.000000e+00 : f32
    %6 = vector.broadcast %cst_5 : f32 to vector<8x64xf32>
    %7 = arith.maximumf %5, %6 : vector<8x64xf32>
    %c0_6 = arith.constant 0 : index
    %c0_7 = arith.constant 0 : index
    %8 = vector.load %arg4[%c0_6, %c0_7] : memref<64x64xf32, #tpu.memory_space<vmem>>, vector<64x64xf32>
    %c0_8 = arith.constant 0 : index
    %c0_9 = arith.constant 0 : index
    %9 = vector.load %arg5[%c0_8, %c0_9] : memref<1x64xf32, #tpu.memory_space<vmem>>, vector<1x64xf32>
    %cst_10 = arith.constant dense<0.000000e+00> : vector<8x64xf32>
    %10 = tpu.matmul %7, %8, %cst_10 {dimension_numbers = #tpu.dot_dimension_numbers<[1], [0], [0], [1], [0, 0, 1, 1], [], []>} : vector<8x64xf32>, vector<64x64xf32>, vector<8x64xf32> -> vector<8x64xf32>
    %11 = vector.broadcast %9 : vector<1x64xf32> to vector<8x64xf32>
    %12 = arith.addf %10, %11 : vector<8x64xf32>
    %cst_11 = arith.constant 0.000000e+00 : f32
    %13 = vector.broadcast %cst_11 : f32 to vector<8x64xf32>
    %14 = arith.maximumf %12, %13 : vector<8x64xf32>
    %c0_12 = arith.constant 0 : index
    %c0_13 = arith.constant 0 : index
    %15 = vector.load %arg6[%c0_12, %c0_13] : memref<64x16xf32, #tpu.memory_space<vmem>>, vector<64x16xf32>
    %c0_14 = arith.constant 0 : index
    %c0_15 = arith.constant 0 : index
    %16 = vector.load %arg7[%c0_14, %c0_15] : memref<1x16xf32, #tpu.memory_space<vmem>>, vector<1x16xf32>
    %cst_16 = arith.constant dense<0.000000e+00> : vector<8x16xf32>
    %17 = tpu.matmul %14, %15, %cst_16 {dimension_numbers = #tpu.dot_dimension_numbers<[1], [0], [0], [1], [0, 0, 1, 1], [], []>} : vector<8x64xf32>, vector<64x16xf32>, vector<8x16xf32> -> vector<8x16xf32>
    %18 = vector.broadcast %16 : vector<1x16xf32> to vector<8x16xf32>
    %19 = arith.addf %17, %18 : vector<8x16xf32>
    %c0_17 = arith.constant 0 : index
    %c0_18 = arith.constant 0 : index
    %20 = vector.load %arg8[%c0_17, %c0_18] : memref<8x16xf32, #tpu.memory_space<vmem>>, vector<8x16xf32>
    tpu.vector_store %arg8[%c0_17, %c0_18], %19 {strides = array<i32>} : memref<8x16xf32, #tpu.memory_space<vmem>>, vector<8x16xf32>,
    return
  }
  func.func @transform_0(%arg0: i32) -> (i32, i32) {
    %c0_i32 = arith.constant 0 : i32
    %c0_i32_0 = arith.constant 0 : i32
    return %arg0, %c0_i32 : i32, i32
  }
  func.func @transform_1(%arg0: i32) -> (i32, i32) {
    %c0_i32 = arith.constant 0 : i32
    %c0_i32_0 = arith.constant 0 : i32
    %c0_i32_1 = arith.constant 0 : i32
    return %c0_i32, %c0_i32_0 : i32, i32
  }
  func.func @transform_2(%arg0: i32) -> (i32, i32) {
    %c0_i32 = arith.constant 0 : i32
    %c0_i32_0 = arith.constant 0 : i32
    %c0_i32_1 = arith.constant 0 : i32
    return %c0_i32, %c0_i32_0 : i32, i32
  }
  func.func @transform_3(%arg0: i32) -> (i32, i32) {
    %c0_i32 = arith.constant 0 : i32
    %c0_i32_0 = arith.constant 0 : i32
    %c0_i32_1 = arith.constant 0 : i32
    return %c0_i32, %c0_i32_0 : i32, i32
  }
  func.func @transform_4(%arg0: i32) -> (i32, i32) {
    %c0_i32 = arith.constant 0 : i32
    %c0_i32_0 = arith.constant 0 : i32
    %c0_i32_1 = arith.constant 0 : i32
    return %c0_i32, %c0_i32_0 : i32, i32
  }
  func.func @transform_5(%arg0: i32) -> (i32, i32) {
    %c0_i32 = arith.constant 0 : i32
    %c0_i32_0 = arith.constant 0 : i32
    %c0_i32_1 = arith.constant 0 : i32
    return %c0_i32, %c0_i32_0 : i32, i32
  }
  func.func @transform_6(%arg0: i32) -> (i32, i32) {
    %c0_i32 = arith.constant 0 : i32
    %c0_i32_0 = arith.constant 0 : i32
    %c0_i32_1 = arith.constant 0 : i32
    return %c0_i32, %c0_i32_0 : i32, i32
  }
  func.func @transform_7(%arg0: i32) -> (i32, i32) {
    %c0_i32 = arith.constant 0 : i32
    %c0_i32_0 = arith.constant 0 : i32
    return %arg0, %c0_i32 : i32, i32
  }
}

</mosaic_0001>

<bundles_post_ra>
// kernel: tpu_custom_call.1
= control target key start
LH: loop header
LB: loop body
LE: loop exit
PB: predicated region body
PF: predicated region fallthrough
CT: control target
= control target key end

     0   :  { %12 = vsyncpa [#allocation3], 0  ;;  %s620_s0 = inlined_call_operand.vmem [shape: f32[8,32], index: 0, kind: input, shape index: {}]   ;;  %s621_s1 = inlined_call_operand.hbm [shape: f32[32,64], index: 1, kind: input, shape index: {}]   ;;  %s622_s2 = inlined_call_operand.vmem [shape: f32[1,64], index: 2, kind: input, shape index: {}]   ;;  %s623_s3 = inlined_call_operand.vmem [shape: f32[64,64], index: 3, kind: input, shape index: {}]   ;;  %s624_s4 = inlined_call_operand.vmem [shape: f32[1,64], index: 4, kind: input, shape index: {}]   ;;  %s625_s5 = inlined_call_operand.vmem [shape: f32[64,16], index: 5, kind: input, shape index: {}]   ;;  %s626_s6 = inlined_call_operand.vmem [shape: f32[1,16], index: 6, kind: input, shape index: {}]   ;;  %s627_s7 = inlined_call_operand.hbm [shape: f32[8,16], index: 7, kind: output, shape index: {}]  }
   0x1   :  { %13 = vsyncpa [#allocation4], 0  ;;  %s486_s24 = smov [#allocation2]   ;;  %s438_s28 = scalar_lea.hbm %s621_s1, 512 }
   0x2   :  { %s21_s25 = sshll.u32 %s486_s24, 4  ;;  %p439_p0 = scmp.ne.s32.totalorder %s621_s1, %s438_s28  ;;  %s22_s25 = int_to_ptr.vmem [resolvable:$true] %s21_s25 }
   0x3   :  { %p442_p1 = scmp.lt.u32.totalorder %s438_s28, %s621_s1 }
   0x5   :  { %p444_p2 = pnand %p442_p1, %p439_p0 }
   0x7   :  { %447 = shalt.err (!%p444_p2)
}
   0x8   :  { %s448_s10 = scalar_lea.vmem %s22_s25, 512  ;;  %p453_p4 = scmp.lt.s32.totalorder %s22_s25, %s22_s25 }
   0x9   :  { %p449_p3 = scmp.ne.s32.totalorder %s22_s25, %s448_s10  ;;  %p454_p5 = scmp.lt.s32.totalorder %s448_s10, %s448_s10 }
   0xb   :  { %p455_p6 = por %p454_p5, %p453_p4 }
   0xd   :  { %p456_p7 = pnand %p455_p6, %p449_p3 }
   0xf   :  { %459 = shalt.err (!%p456_p7)
}
  0x10   :  { %s487_s11 = smov 128   ;;  %s488_s12 = smov 8  }
  0x11   :  { %27 = dma.hbm_to_vmem [thread:$0]  %s621_s1, 512, %s22_s25, [#allocation3], %s487_s11, %s487_s11, %s488_s12  }
  0x12   :  { %482 = dma.done.wait [#allocation3], 512  }
  0x13   :  { %483 = vsyncadd [#allocation3], 4294966784  ;;  %v489_v0 = vmov 0.0|0.0   ;;  %vm490_vm0 = vmmov 0   ;;  %v491_v1 = vmov 0.0   ;;  %v42_v2 = vld [vmem:[#allocation2] sm:$0xff] }
  0x14   :  { %401 = vmatprep.subr.bf16.mxu0 %v489_v0  ;;  %360 = vmatprep.mubr.msk.f32.mxu0 %vm490_vm0, %v491_v1  ;;  %v43_v3 = vld [vmem:[#allocation2 + $0x8] sm:$0xff]  ;;  %v44_v4 = vld [vmem:[#allocation2 + $0x10] sm:$0xff]  ;;  %v45_v6 = vld [vmem:[#allocation2 + $0x18] sm:$0xff]  ;;  %vm53_vm1 = vcmask 261120   ;;  %vm143_vm2 = vcmask 523264   ;;  %s492_s27 = smov [#allocation5]  }
  0x15   :  { %407 = vmatprep.subr.bf16.mxu1 %v489_v0  ;;  %379 = vmatprep.mubr.msk.f32.mxu1 %vm490_vm0, %v491_v1  ;;  %v402_v5 = vpack.c.bf16 %v43_v3, %v42_v2  ;;  %v128_v7 = vld [vmem:[%s623_s3] sm:$0xff]  ;;  %v129_v8 = vld [vmem:[%s623_s3 + $0x8] sm:$0xff]  ;;  %v130_v9 = vld [vmem:[%s623_s3 + $0x10] sm:$0xff]  ;;  %v405_v11 = vpack.c.bf16 %v45_v6, %v44_v4  ;;  %s314_s28 = sshll.u32 %s492_s27, 4  ;;  %vm306_vm3 = vcmask 130048   ;;  %s315_s28 = int_to_ptr.vmem [resolvable:$true] %s314_s28 }
  0x16   :  { %v131_v10 = vld [vmem:[%s623_s3 + $0x18] sm:$0xff]  ;;  %v408_v12 = vpack.c.bf16 %v129_v8, %v128_v7  ;;  %v132_v14 = vld [vmem:[%s623_s3 + $0x20] sm:$0xff]  ;;  %v133_v15 = vld [vmem:[%s623_s3 + $0x28] sm:$0xff]  ;;  %p465_p9 = scmp.lt.s32.totalorder %s315_s28, %s315_s28 }
  0x17   :  { %403 = vmatpush3.bf16.msra.mxu0 %v402_v5  ;;  %v411_v13 = vpack.c.bf16 %v131_v10, %v130_v9  ;;  %v41_v16 = vld [vmem:[%s620_s0] sm:$0xff]  ;;  %v414_v17 = vpack.c.bf16 %v133_v15, %v132_v14  ;;  %v134_v18 = vld [vmem:[%s623_s3 + $0x30] sm:$0xff]  ;;  %v135_v19 = vld [vmem:[%s623_s3 + $0x38] sm:$0xff] }
  0x18   :  { %404 = vmatprep.subr.bf16.mxu0 %v489_v0  ;;  %409 = vmatpush3.bf16.msra.mxu1 %v408_v12  ;;  %v417_v20 = vpack.c.bf16 %v135_v19, %v134_v18  ;;  %v218_v21 = vld [vmem:[%s625_s5] sm:$0xff]  ;;  %v219_v22 = vld [vmem:[%s625_s5 + $0x8] sm:$0xff]  ;;  %v220_v23 = vld [vmem:[%s625_s5 + $0x10] sm:$0xff] }
  0x19   :  { %410 = vmatprep.subr.bf16.mxu1 %v489_v0  ;;  %v420_v24 = vpack.c.bf16 %v219_v22, %v218_v21  ;;  %v221_v25 = vld [vmem:[%s625_s5 + $0x18] sm:$0xff]  ;;  %v222_v27 = vld [vmem:[%s625_s5 + $0x20] sm:$0xff]  ;;  %v223_v28 = vld [vmem:[%s625_s5 + $0x28] sm:$0xff] }
  0x1a   :  { %v423_v26 = vpack.c.bf16 %v221_v25, %v220_v23  ;;  %v426_v29 = vpack.c.bf16 %v223_v28, %v222_v27  ;;  %v323_v30 = vld [vmem:[%s622_s2] ss:$0 sm:$0xff]  ;;  %v224_v35 = vld [vmem:[%s625_s5 + $0x30] sm:$0xff]  ;;  %v225_v36 = vld [vmem:[%s625_s5 + $0x38] sm:$0xff]  ;;  %s460_s5 = scalar_lea.vmem %s315_s28, 128 }
  0x1b   :  { %406 = vmatpush3.bf16.msra.mxu0 %v405_v11  ;;  %v429_v37 = vpack.c.bf16 %v225_v36, %v224_v35  ;;  %v325_v38 = vld [vmem:[%s624_s4] ss:$0 sm:$0xff]  ;;  %p461_p8 = scmp.ne.s32.totalorder %s315_s28, %s460_s5  ;;  %p466_p10 = scmp.lt.s32.totalorder %s460_s5, %s460_s5 }
  0x1c   :  { %419 = vmatprep.subr.bf16.mxu0 %v489_v0  ;;  %412 = vmatpush3.bf16.msra.mxu1 %v411_v13  ;;  %v327_v43 = vld [vmem:[%s626_s6] ss:$0 sm:$0xff] }
  0x1d   :  { %413 = vmatprep.subr.bf16.mxu1 %v489_v0  ;;  %p467_p11 = por %p466_p10, %p465_p9 }
  0x1e   :  { %361 = vmatmul.mubr.msk.f32.vlgmr.msra.gmra.mrb[0].mxu0 %vm53_vm1, %v41_v16 }
  0x1f   :  { %398 = vmatprep.mubr.msk.f32.mxu0 %vm490_vm0, %v491_v1  ;;  %421 = vmatpush3.bf16.msra.mxu0 %v420_v24  ;;  %p468_p12 = pnand %p467_p11, %p461_p8 }
  0x20   :  { %415 = vmatpush3.bf16.msra.mxu1 %v414_v17  ;;  %422 = vmatprep.subr.bf16.mxu0 %v489_v0 }
  0x21   :  { %416 = vmatprep.subr.bf16.mxu1 %v489_v0 }
  0x23   :  { %424 = vmatpush3.bf16.msra.mxu0 %v423_v26 }
  0x24   :  { %418 = vmatpush3.bf16.msra.mxu1 %v417_v20  ;;  %425 = vmatprep.subr.bf16.mxu0 %v489_v0 }
  0x27   :  { %427 = vmatpush3.bf16.msra.mxu0 %v426_v29 }
  0x28   :  { %428 = vmatprep.subr.bf16.mxu0 %v489_v0 }
  0x2b   :  { %430 = vmatpush3.bf16.msra.mxu0 %v429_v37 }
  0xf1   :  { %v123_v31 = vpop.f32.mrb[0].mxu0 }
  0xf2   :  { %v124_v32 = vadd.f32 %v323_v30, %v123_v31  ;;  %v362_v33 = vpop.f32.mrb[1].mxu0 }
  0xf4   :  { %v127_v34 = vmax.f32 %v124_v32, 0.0 }
  0xf6   :  { %380 = vmatmul.mubr.msk.f32.vlgmr.msra.gmra.mrb[0].mxu1 %vm143_vm2, %v127_v34 }
 0x1c9   :  { %v213_v39 = vpop.f32.mrb[0].mxu1 }
 0x1ca   :  { %v214_v40 = vadd.f32 %v325_v38, %v213_v39  ;;  %v381_v41 = vpop.f32.mrb[1].mxu1 }
 0x1cc   :  { %v217_v42 = vmax.f32 %v214_v40, 0.0 }
 0x1ce   :  { %399 = vmatmul.mubr.msk.f32.vlgmr.msra.gmra.mrb[2].mxu0 %vm143_vm2, %v217_v42 }
 0x2a1   :  { %v302_v44 = vpop.f32.mrb[2].mxu0 }
 0x2a2   :  { %v303_v45 = vadd.f32 %v327_v43, %v302_v44  ;;  %v400_v46 = vpop.f32.mrb[3].mxu0 }
 0x2a4   :  { %307 = vst.msk [vmem:[#allocation5] sm:$0xff] %vm306_vm3, %v303_v45 }
 0x2a5   :  { %471 = shalt.err (!%p468_p12)
}
 0x2a6   :  { %s472_s30 = scalar_lea.hbm %s627_s7, 128 }
 0x2a7   :  { %p473_p13 = scmp.ne.s32.totalorder %s627_s7, %s472_s30  ;;  %p476_p0 = scmp.lt.u32.totalorder %s472_s30, %s627_s7 }
 0x2a9   :  { %p478_p1 = pnand %p476_p0, %p473_p13 }
 0x2ab   :  { %481 = shalt.err (!%p478_p1)
}
 0x2ac   :  { %317 = dma.vmem_to_hbm [thread:$0]  %s315_s28, 128, %s627_s7, [#allocation4]  }
 0x2ad   :  { %484 = dma.done.wait [#allocation4], 128  }
 0x2ae   :  { %485 = vsyncadd [#allocation4], 4294967168 }
 0x2af   :  { %321 = vsyncpa [#allocation3], 1 }
 0x2b0   :  { %322 = vsyncpa [#allocation4], 1 }

</bundles_post_ra>
